<compile_context>
chip_gen: v7x
topology: tpu7x:2x2x1
jax: 0.10.0
libtpu: 0.0.40
codegen_flags: <defaults>
</compile_context>

<pallas_src>
import functools
import math

import jax
import jax.numpy as jnp
from jax import lax
from jax.experimental import pallas as pl
from jax.experimental.pallas import tpu as pltpu
import numpy as np


@functools.lru_cache(maxsize=None)
def _vmem_limit_bytes():
    """Per-generation scoped-VMEM limit (v5e/v6e ~96 MiB, v7x ~48 MiB)."""
    try:
        cap = int(pltpu.get_tpu_info().vmem_capacity_bytes)
        if cap <= 0:
            raise ValueError("bad vmem capacity")
    except Exception:
        cap = 64 * 1024 * 1024                      # conservative: v7x physical
    return max(32 * 1024 * 1024, min((cap * 3) // 4, 100 * 1024 * 1024))


def _pick_tile(dim, candidates):
    """Largest candidate that evenly divides `dim`, else the full dim."""
    for c in candidates:
        if dim >= c and dim % c == 0:
            return c
    return dim                                       # full dim is always legal


def _round_up(x, m):
    return ((x + m - 1) // m) * m


# ----------------------------------------------------------------------------
# Tiled linear kernel:  y = x @ W^T + b   (torch nn.Linear semantics, W (N, K))
# ----------------------------------------------------------------------------
def _linear_kernel(x_ref, w_ref, b_ref, o_ref, acc_ref, *, compute_dtype):
    @pl.when(pl.program_id(2) == 0)
    def _():
        acc_ref[...] = jnp.zeros_like(acc_ref)

    x = x_ref[...].astype(compute_dtype)             # (tm, tk)
    w = w_ref[...].astype(compute_dtype)             # (tn, tk)
    acc_ref[...] += lax.dot_general(
        x, w, (((1,), (1,)), ((), ())), preferred_element_type=jnp.float32)

    @pl.when(pl.program_id(2) == pl.num_programs(2) - 1)
    def _():
        o_ref[...] = (acc_ref[...] + b_ref[...]).astype(o_ref.dtype)


def linear(x, w, b, *, compute_dtype=jnp.bfloat16, out_dtype=None):
    """x: (M, K), w: (N, K), b: (N,) -> (M, N)."""
    M, K = x.shape
    N = w.shape[0]
    out_dtype = out_dtype if out_dtype is not None else x.dtype

    # Big tiles (review: roofline fraction rises steeply with tile size); all
    # candidates are multiples of (8, 128) so the block shapes stay legal.
    tm = M if M <= 512 else _pick_tile(M, (512, 256, 128))
    tn = N if N <= 512 else _pick_tile(N, (512, 256, 128))
    tk = K if K <= 1024 else _pick_tile(K, (1024, 512, 256))

    m_pad = M
    if tm == M and M > 512:
        # Harden large non-divisible M: pad to a multiple of 256 so the M axis
        # stays pipelined instead of one giant un-pipelined block.  The padded
        # rows are zeros and sliced off below.
        m_pad = _round_up(M, 256)
        tm = 256
        x = jnp.pad(x, ((0, m_pad - M), (0, 0)))
    # TODO(synk): large non-divisible N/K (weight dims) still fall back to a
    #             full-dim block; pad-and-mask tiling would be needed there.

    kernel = functools.partial(_linear_kernel, compute_dtype=compute_dtype)
    out = pl.pallas_call(
        kernel,
        out_shape=jax.ShapeDtypeStruct((m_pad, N), out_dtype),
        grid=(m_pad // tm, N // tn, K // tk),
        in_specs=[
            pl.BlockSpec((tm, tk), lambda i, j, k: (i, k)),
            pl.BlockSpec((tn, tk), lambda i, j, k: (j, k)),
            pl.BlockSpec((1, tn), lambda i, j, k: (0, j)),
        ],
        out_specs=pl.BlockSpec((tm, tn), lambda i, j, k: (i, j)),
        scratch_shapes=[pltpu.VMEM((tm, tn), jnp.float32)],
        compiler_params=pltpu.CompilerParams(
            dimension_semantics=("parallel", "parallel", "arbitrary"),
            vmem_limit_bytes=_vmem_limit_bytes()),
    )(x, w, b.reshape(1, N))
    return out[:M] if m_pad != M else out


# ----------------------------------------------------------------------------
# Batched-head attention kernel.
# q block (1, H, tq, Dh), k/v blocks (1, H, S, Dh)  ->  o block (1, tq, E).
# All heads handled by two leading-batch dot_generals; softmax math in f32.
# ----------------------------------------------------------------------------
def _attn_kernel(q_ref, k_ref, v_ref, o_ref, *w_refs, weights_mode,
                 compute_dtype, approx_recip):
    num_heads = q_ref.shape[1]

    q = q_ref[0].astype(compute_dtype)               # (H, tq, Dh), scaling folded in
    k = k_ref[0].astype(compute_dtype)               # (H, S,  Dh)
    v = v_ref[0].astype(compute_dtype)               # (H, S,  Dh)

    # scores for ALL heads in one batched MXU contraction: (H, tq, S) in f32
    s = lax.dot_general(q, k, (((2,), (2,)), ((0,), (0,))),
                        preferred_element_type=jnp.float32)

    # softmax over keys; elementwise math kept in f32 (v5e has no bf16 VPU/EUP)
    m = jnp.max(s, axis=-1, keepdims=True)
    e = jnp.exp(s - m)
    denom = jnp.sum(e, axis=-1, keepdims=True)
    p = e * pl.reciprocal(denom, approx=approx_recip)

    # (H, tq, Dh) in one batched contraction
    o = lax.dot_general(p.astype(compute_dtype), v, (((2,), (1,)), ((0,), (0,))),
                        preferred_element_type=jnp.float32)

    # merge heads on the lane axis in-register -> single lane-dense (tq, E) store
    o_ref[0] = jnp.concatenate(
        [o[h] for h in range(num_heads)], axis=-1).astype(o_ref.dtype)

    if weights_mode == "mean":
        w_refs[0][0] = (jnp.sum(p, axis=0) * (1.0 / num_heads)).astype(
            w_refs[0].dtype)
    elif weights_mode == "per_head":
        w_refs[0][0] = p.astype(w_refs[0].dtype)


def fused_attention(q, k, v, *, weights_mode, compute_dtype, out_dtype,
                    weights_dtype=jnp.float32, approx_recip=True):
    """q, k, v: (B, H, T, Dh) -> attn (B, T, E) [+ weights (B,T,S) or (B,H,T,S)]."""
    B, H, T, Dh = q.shape
    S = k.shape[2]
    E = H * Dh

    # Tile the query axis: scales q / output / weight blocks with tq and gives
    # v7x's two TensorCores a second parallel axis at small batch.
    tq = _pick_tile(T, (256, 128))

    kernel = functools.partial(_attn_kernel, weights_mode=weights_mode,
                               compute_dtype=compute_dtype,
                               approx_recip=approx_recip)

    out_shapes = [jax.ShapeDtypeStruct((B, T, E), out_dtype)]
    out_specs = [pl.BlockSpec((1, tq, E), lambda b, t: (b, t, 0))]
    if weights_mode == "mean":
        out_shapes.append(jax.ShapeDtypeStruct((B, T, S), weights_dtype))
        out_specs.append(pl.BlockSpec((1, tq, S), lambda b, t: (b, t, 0)))
    elif weights_mode == "per_head":
        out_shapes.append(jax.ShapeDtypeStruct((B, H, T, S), weights_dtype))
        out_specs.append(pl.BlockSpec((1, H, tq, S), lambda b, t: (b, 0, t, 0)))

    outs = pl.pallas_call(
        kernel,
        out_shape=tuple(out_shapes),
        grid=(B, T // tq),
        in_specs=[
            pl.BlockSpec((1, H, tq, Dh), lambda b, t: (b, 0, t, 0)),
            pl.BlockSpec((1, H, S, Dh), lambda b, t: (b, 0, 0, 0)),
            pl.BlockSpec((1, H, S, Dh), lambda b, t: (b, 0, 0, 0)),
        ],
        out_specs=tuple(out_specs),
        compiler_params=pltpu.CompilerParams(
            dimension_semantics=("parallel", "parallel"),
            vmem_limit_bytes=_vmem_limit_bytes()),
    )(q, k, v)

    if weights_mode == "none":
        return outs[0], None
    return outs[0], outs[1]


# ----------------------------------------------------------------------------
# Parameter prep (done once) + MultiheadAttention (self-attention) forward
# ----------------------------------------------------------------------------
def prepare_params(params, num_heads):
    """Stack Q/K/V weights once with the 1/sqrt(Dh) scaling folded into Q."""
    E = params["q_w"].shape[0]
    scaling = (E // num_heads) ** (-0.5)
    return {
        "w_qkv": jnp.concatenate(
            [params["q_w"] * scaling, params["k_w"], params["v_w"]], axis=0),
        "b_qkv": jnp.concatenate(
            [params["q_b"] * scaling, params["k_b"], params["v_b"]]),
        "out_w": params["out_w"],
        "out_b": params["out_b"],
    }


def multihead_attention_forward(query, prepared, num_heads, need_weights=True,
                                need_head_weights=False,
                                compute_dtype=jnp.bfloat16,
                                weights_dtype=jnp.float32,
                                approx_recip=True):
    """query: (T, B, E). Returns (attn (T,B,E), attn_weights or None)."""
    T, B, E = query.shape
    H = num_heads
    Dh = E // H
    if need_head_weights:
        need_weights = True

    # batch-major once at entry
    x_bt = jnp.transpose(query, (1, 0, 2)).reshape(B * T, E)

    # fused QKV projection (x read from HBM once); intermediate kept in
    # compute_dtype (bf16 in production) to halve HBM traffic downstream
    qkv = linear(x_bt, prepared["w_qkv"], prepared["b_qkv"],
                 compute_dtype=compute_dtype, out_dtype=compute_dtype)

    # head split to (B, H, T, Dh) so the attention kernel can use leading-batch
    # contractions and lane-dense stores (one XLA transpose, like fairseq's own
    # contiguous().view().transpose())
    qkv = qkv.reshape(B, T, 3, H, Dh)
    qkv = jnp.transpose(qkv, (2, 0, 3, 1, 4))        # (3, B, H, T, Dh)
    q, k, v = qkv[0], qkv[1], qkv[2]

    weights_mode = ("per_head" if need_head_weights
                    else ("mean" if need_weights else "none"))
    attn_bt, w = fused_attention(
        q, k, v, weights_mode=weights_mode, compute_dtype=compute_dtype,
        out_dtype=compute_dtype, weights_dtype=weights_dtype,
        approx_recip=approx_recip)

    out = linear(attn_bt.reshape(B * T, E), prepared["out_w"],
                 prepared["out_b"], compute_dtype=compute_dtype,
                 out_dtype=query.dtype)
    attn = jnp.transpose(out.reshape(B, T, E), (1, 0, 2))          # (T, B, E)

    weights = None
    if need_weights:
        if need_head_weights:
            weights = jnp.transpose(w, (1, 0, 2, 3))               # (H, B, T, S)
        else:
            weights = w                                            # (B, T, S)
    return attn, weights


# ----------------------------------------------------------------------------
# Deterministic parameter init (xavier_uniform, fairseq-style gains)
# ----------------------------------------------------------------------------
def init_params(key, embed_dim):
    def xavier_uniform(k, shape, gain=1.0):
        fan_out, fan_in = shape
        limit = gain * math.sqrt(6.0 / (fan_in + fan_out))
        return jax.random.uniform(k, shape, jnp.float32, -limit, limit)

    ks = jax.random.split(key, 8)
    g = 1.0 / math.sqrt(2.0)
    E = embed_dim
    return {
        "q_w": xavier_uniform(ks[0], (E, E), g),
        "k_w": xavier_uniform(ks[1], (E, E), g),
        "v_w": xavier_uniform(ks[2], (E, E), g),
        "out_w": xavier_uniform(ks[3], (E, E), 1.0),
        "q_b": jax.random.uniform(ks[4], (E,), jnp.float32, -0.1, 0.1),
        "k_b": jax.random.uniform(ks[5], (E,), jnp.float32, -0.1, 0.1),
        "v_b": jax.random.uniform(ks[6], (E,), jnp.float32, -0.1, 0.1),
        "out_b": jnp.zeros((E,), jnp.float32),
    }


# ----------------------------------------------------------------------------
# Pure-JAX reference (mirrors fairseq's multi_head_attention_forward path)
# ----------------------------------------------------------------------------
def reference_forward(query, params, num_heads):
    T, B, E = query.shape
    H, Dh = num_heads, E // num_heads
    x = query.reshape(T * B, E)
    q = (x @ params["q_w"].T + params["q_b"]) * (Dh ** -0.5)
    k = x @ params["k_w"].T + params["k_b"]
    v = x @ params["v_w"].T + params["v_b"]
    qh = jnp.transpose(q.reshape(T, B * H, Dh), (1, 0, 2))
    kh = jnp.transpose(k.reshape(T, B * H, Dh), (1, 0, 2))
    vh = jnp.transpose(v.reshape(T, B * H, Dh), (1, 0, 2))
    s = jnp.einsum("btd,bsd->bts", qh, kh)
    p = jax.nn.softmax(s, axis=-1)
    a = jnp.einsum("bts,bsd->btd", p, vh)
    a = jnp.transpose(a, (1, 0, 2)).reshape(T, B, E)
    out = a.reshape(T * B, E) @ params["out_w"].T + params["out_b"]
    w = jnp.mean(p.reshape(B, H, T, T), axis=1)
    return out.reshape(T, B, E), w


if __name__ == "__main__":
    T, B, E, H = 8, 2, 32, 4   # seq=8, batch=2, embed=32, 4 heads (head_dim=8)

    key = jax.random.PRNGKey(0)
    k_params, k_query = jax.random.split(key)
    params = init_params(k_params, E)
    prepared = prepare_params(params, H)            # once, not per forward call
    query = jax.random.normal(k_query, (T, B, E), jnp.float32)

    ref_attn, ref_w = reference_forward(query, params, H)

    # 1) f32 MXU operands + exact reciprocal: tight check vs the fp32 reference.
    attn, attn_w = multihead_attention_forward(
        query, prepared, num_heads=H, need_weights=True,
        compute_dtype=jnp.float32, approx_recip=False)
    jax.block_until_ready(attn)
    jax.block_until_ready(attn_w)
    np.testing.assert_allclose(np.asarray(attn), np.asarray(ref_attn),
                               rtol=1e-4, atol=1e-4)
    np.testing.assert_allclose(np.asarray(attn_w), np.asarray(ref_w),
                               rtol=1e-4, atol=1e-4)

    # 2) production defaults: bf16 MXU operands (f32 accumulation, f32 softmax
    #    elementwise math) + EUP approx reciprocal.  Loose tolerance for bf16.
    attn_bf, attn_w_bf = multihead_attention_forward(
        query, prepared, num_heads=H, need_weights=True)
    jax.block_until_ready(attn_bf)
    jax.block_until_ready(attn_w_bf)
    np.testing.assert_allclose(np.asarray(attn_bf), np.asarray(ref_attn),
                               rtol=5e-2, atol=5e-2)
    np.testing.assert_allclose(np.asarray(attn_w_bf), np.asarray(ref_w),
                               rtol=5e-2, atol=5e-2)

    print("KERNEL_OK")
</pallas_src>

<mosaic_0001>
module attributes {stable_mosaic.version = 11 : i64} {
  func.func @_linear_kernel(%arg0: i32, %arg1: i32, %arg2: i32, %arg3: memref<16x32xf32, #tpu.memory_space<vmem>>, %arg4: memref<96x32xf32, #tpu.memory_space<vmem>>, %arg5: memref<1x96xf32, #tpu.memory_space<vmem>>, %arg6: memref<16x96xf32, #tpu.memory_space<vmem>>, %arg7: memref<16x96xf32, #tpu.memory_space<vmem>>) attributes {dimension_semantics = [#tpu.dimension_semantics<parallel>, #tpu.dimension_semantics<parallel>, #tpu.dimension_semantics<arbitrary>], iteration_bounds = array<i64: 1, 1, 1>, scalar_prefetch = 0 : i64, scratch_operands = 1 : i64, tpu.core_type = #tpu.core_type<tc>, window_params = [{transform_indices = @transform_0, window_bounds = array<i64: 16, 32>}, {transform_indices = @transform_1, window_bounds = array<i64: 96, 32>}, {transform_indices = @transform_2, window_bounds = array<i64: 1, 96>}, {transform_indices = @transform_3, window_bounds = array<i64: 16, 96>}]} {
    %c0_i32 = arith.constant 0 : i32
    %0 = arith.cmpi eq, %arg2, %c0_i32 : i32
    %1 = arith.extui %0 : i1 to i32
    %c0_i32_0 = arith.constant 0 : i32
    %2 = arith.cmpi ne, %1, %c0_i32_0 : i32
    scf.if %2 {
      %cst_10 = arith.constant 0.000000e+00 : f32
      %12 = vector.broadcast %cst_10 : f32 to vector<16x96xf32>
      %c0_11 = arith.constant 0 : index
      %c0_12 = arith.constant 0 : index
      %13 = vector.load %arg7[%c0_11, %c0_12] : memref<16x96xf32, #tpu.memory_space<vmem>>, vector<16x96xf32>
      tpu.vector_store %arg7[%c0_11, %c0_12], %12 {strides = array<i32>} : memref<16x96xf32, #tpu.memory_space<vmem>>, vector<16x96xf32>,
    } else {
    }
    %c0 = arith.constant 0 : index
    %c0_1 = arith.constant 0 : index
    %3 = vector.load %arg3[%c0, %c0_1] : memref<16x32xf32, #tpu.memory_space<vmem>>, vector<16x32xf32>
    %c0_2 = arith.constant 0 : index
    %c0_3 = arith.constant 0 : index
    %4 = vector.load %arg4[%c0_2, %c0_3] : memref<96x32xf32, #tpu.memory_space<vmem>>, vector<96x32xf32>
    %c0_4 = arith.constant 0 : index
    %c0_5 = arith.constant 0 : index
    %5 = vector.load %arg7[%c0_4, %c0_5] : memref<16x96xf32, #tpu.memory_space<vmem>>, vector<16x96xf32>
    %cst = arith.constant dense<0.000000e+00> : vector<16x96xf32>
    %6 = tpu.matmul %3, %4, %cst {dimension_numbers = #tpu.dot_dimension_numbers<[1], [1], [0], [0], [0, 0, 1, 0], [], []>} : vector<16x32xf32>, vector<96x32xf32>, vector<16x96xf32> -> vector<16x96xf32>
    %7 = arith.addf %5, %6 : vector<16x96xf32>
    %c0_6 = arith.constant 0 : index
    %c0_7 = arith.constant 0 : index
    %8 = vector.load %arg7[%c0_6, %c0_7] : memref<16x96xf32, #tpu.memory_space<vmem>>, vector<16x96xf32>
    tpu.vector_store %arg7[%c0_6, %c0_7], %7 {strides = array<i32>} : memref<16x96xf32, #tpu.memory_space<vmem>>, vector<16x96xf32>,
    %c0_i32_8 = arith.constant 0 : i32
    %9 = arith.cmpi eq, %arg2, %c0_i32_8 : i32
    %10 = arith.extui %9 : i1 to i32
    %c0_i32_9 = arith.constant 0 : i32
    %11 = arith.cmpi ne, %10, %c0_i32_9 : i32
    scf.if %11 {
      %c0_10 = arith.constant 0 : index
      %c0_11 = arith.constant 0 : index
      %12 = vector.load %arg7[%c0_10, %c0_11] : memref<16x96xf32, #tpu.memory_space<vmem>>, vector<16x96xf32>
      %c0_12 = arith.constant 0 : index
      %c0_13 = arith.constant 0 : index
      %13 = vector.load %arg5[%c0_12, %c0_13] : memref<1x96xf32, #tpu.memory_space<vmem>>, vector<1x96xf32>
      %14 = vector.broadcast %13 : vector<1x96xf32> to vector<16x96xf32>
      %15 = arith.addf %12, %14 : vector<16x96xf32>
      %c0_14 = arith.constant 0 : index
      %c0_15 = arith.constant 0 : index
      %16 = vector.load %arg6[%c0_14, %c0_15] : memref<16x96xf32, #tpu.memory_space<vmem>>, vector<16x96xf32>
      tpu.vector_store %arg6[%c0_14, %c0_15], %15 {strides = array<i32>} : memref<16x96xf32, #tpu.memory_space<vmem>>, vector<16x96xf32>,
    } else {
    }
    return
  }
  func.func @transform_0(%arg0: i32, %arg1: i32, %arg2: i32) -> (i32, i32) {
    %c0_i32 = arith.constant 0 : i32
    return %arg0, %arg2 : i32, i32
  }
  func.func @transform_1(%arg0: i32, %arg1: i32, %arg2: i32) -> (i32, i32) {
    %c0_i32 = arith.constant 0 : i32
    return %arg1, %arg2 : i32, i32
  }
  func.func @transform_2(%arg0: i32, %arg1: i32, %arg2: i32) -> (i32, i32) {
    %c0_i32 = arith.constant 0 : i32
    %c0_i32_0 = arith.constant 0 : i32
    return %c0_i32, %arg1 : i32, i32
  }
  func.func @transform_3(%arg0: i32, %arg1: i32, %arg2: i32) -> (i32, i32) {
    %c0_i32 = arith.constant 0 : i32
    return %arg0, %arg1 : i32, i32
  }
}

</mosaic_0001>

<bundles_post_ra>
// kernel: tpu_custom_call.1
= control target key start
LH: loop header
LB: loop body
LE: loop exit
PB: predicated region body
PF: predicated region fallthrough
CT: control target
= control target key end

     0   :  { %vm38_vm0 = vcmask 261120   ;;  %vm19_vm1 = vcmask 785408   ;;  %v313_v6 = vmov 0.0   ;;  %s432_s0 = inlined_call_operand.vmem [shape: f32[16,32], index: 0, kind: input, shape index: {}]   ;;  %s433_s1 = inlined_call_operand.vmem [shape: f32[96,32], index: 1, kind: input, shape index: {}]   ;;  %s434_s2 = inlined_call_operand.vmem [shape: f32[1,96], index: 2, kind: input, shape index: {}]   ;;  %s435_s3 = inlined_call_operand.hbm [shape: f32[16,96], index: 3, kind: output, shape index: {}]  }
   0x1   :  { %v24_v0 = vld [vmem:[%s433_s1] sm:$0xff]  ;;  %v25_v1 = vld [vmem:[%s433_s1 + $0x8] sm:$0xff]  ;;  %v26_v2 = vld [vmem:[%s433_s1 + $0x10] sm:$0xff]  ;;  %21 = vst.msk [vmem:[#allocation2 + $0x8] sm:$0xff] %vm19_vm1, %v313_v6 }
   0x2   :  { %v249_v3 = vpack.c.bf16 %v25_v1, %v24_v0  ;;  %vm348_vm2 = vmpackc.low %vm38_vm0, %vm38_vm0  ;;  %v27_v5 = vld [vmem:[%s433_s1 + $0x18] sm:$0xff]  ;;  %20 = vst.msk [vmem:[#allocation2] sm:$0xff] %vm19_vm1, %v313_v6  ;;  %v22_v8 = vld [vmem:[%s432_s0] sm:$0xff] }
   0x3   :  { %v255_v7 = vpack.c.bf16 %v27_v5, %v26_v2  ;;  %246 = vmatprep.mubr.msk.f32.mxu0 %vm38_vm0, %v22_v8 }
   0x4   :  { %251 = vmatprep.subr.msk.bf16.mxu0 %vm348_vm2, %v249_v3 }
   0x5   :  { %254 = vmatpush3.bf16.xpose.msk.msra.mxu0 %vm348_vm2, %v249_v3 }
   0x6   :  { %257 = vmatprep.subr.msk.bf16.mxu0 %vm348_vm2, %v255_v7 }
   0x7   :  { %8 = vsyncpa [#allocation4], 0  ;;  %v28_v9 = vld [vmem:[%s433_s1 + $0x20] sm:$0xff]  ;;  %v29_v10 = vld [vmem:[%s433_s1 + $0x28] sm:$0xff]  ;;  %s314_s14 = smov [#allocation3]  }
   0x8   :  { %v261_v11 = vpack.c.bf16 %v29_v10, %v28_v9  ;;  %v30_v12 = vld [vmem:[%s433_s1 + $0x30] sm:$0xff]  ;;  %v31_v13 = vld [vmem:[%s433_s1 + $0x38] sm:$0xff]  ;;  %v32_v15 = vld [vmem:[%s433_s1 + $0x40] sm:$0xff]  ;;  %s182_s15 = sshll.u32 %s314_s14, 4  ;;  %s183_s15 = int_to_ptr.vmem [resolvable:$true] %s182_s15 }
   0x9   :  { %v267_v14 = vpack.c.bf16 %v31_v13, %v30_v12  ;;  %v33_v16 = vld [vmem:[%s433_s1 + $0x48] sm:$0xff]  ;;  %v34_v18 = vld [vmem:[%s433_s1 + $0x50] sm:$0xff]  ;;  %v35_v19 = vld [vmem:[%s433_s1 + $0x58] sm:$0xff]  ;;  %p294_p1 = scmp.lt.s32.totalorder %s183_s15, %s183_s15 }
   0xa   :  { %v273_v17 = vpack.c.bf16 %v33_v16, %v32_v15  ;;  %v279_v20 = vpack.c.bf16 %v35_v19, %v34_v18  ;;  %v23_v21 = vld [vmem:[%s432_s0 + $0x8] sm:$0xff]  ;;  %v36_v23 = vld [vmem:[#allocation2] sm:$0xff]  ;;  %s289_s0 = scalar_lea.vmem %s183_s15, 256 }
   0xb   :  { %v37_v22 = vld [vmem:[#allocation2 + $0x8] sm:$0xff]  ;;  %v207_v28 = vld [vmem:[%s434_s2] ss:$0 sm:$0xff]  ;;  %p290_p0 = scmp.ne.s32.totalorder %s183_s15, %s289_s0  ;;  %p295_p2 = scmp.lt.s32.totalorder %s289_s0, %s289_s0 }
   0xd   :  { %260 = vmatpush3.bf16.xpose.msk.msra.mxu0 %vm348_vm2, %v255_v7  ;;  %p296_p3 = por %p295_p2, %p294_p1 }
   0xe   :  { %263 = vmatprep.subr.msk.bf16.mxu0 %vm348_vm2, %v261_v11 }
   0xf   :  { %p297_p4 = pnand %p296_p3, %p290_p0 }
  0x15   :  { %266 = vmatpush3.bf16.xpose.msk.msra.mxu0 %vm348_vm2, %v261_v11 }
  0x16   :  { %269 = vmatprep.subr.msk.bf16.mxu0 %vm348_vm2, %v267_v14 }
  0x1d   :  { %272 = vmatpush3.bf16.xpose.msk.msra.mxu0 %vm348_vm2, %v267_v14 }
  0x1e   :  { %275 = vmatprep.subr.msk.bf16.mxu0 %vm348_vm2, %v273_v17 }
  0x25   :  { %278 = vmatpush3.bf16.xpose.msk.msra.mxu0 %vm348_vm2, %v273_v17 }
  0x26   :  { %281 = vmatprep.subr.msk.bf16.mxu0 %vm348_vm2, %v279_v20 }
  0x2d   :  { %284 = vmatpush3.bf16.xpose.msk.msra.mxu0 %vm348_vm2, %v279_v20 }
  0x34   :  { %247 = vmatmul.mubr.msk.f32.vlgmr.msra.gmra.mrb[0].mxu0 %vm38_vm0, %v23_v21 }
 0x107   :  { %v248_v24 = vpop.f32.mrb[0].mxu0 }
 0x108   :  { %v157_v25 = vadd.f32 %v248_v24, %v37_v22  ;;  %v147_v26 = vpop.f32.mrb[1].mxu0 }
 0x109   :  { %v156_v27 = vadd.f32 %v147_v26, %v36_v23 }
 0x10a   :  { %160 = vst.msk [vmem:[#allocation2 + $0x8] sm:$0xff] %vm19_vm1, %v157_v25 }
 0x10b   :  { %159 = vst.msk [vmem:[#allocation2] sm:$0xff] %vm19_vm1, %v156_v27 }
 0x111   :  { %v165_v29 = vld [vmem:[#allocation2 + $0x8] sm:$0xff] }
 0x112   :  { %v164_v30 = vld [vmem:[#allocation2] sm:$0xff]  ;;  %v174_v31 = vadd.f32 %v207_v28, %v165_v29 }
 0x113   :  { %v173_v32 = vadd.f32 %v207_v28, %v164_v30 }
 0x114   :  { %176 = vst.msk [vmem:[#allocation3 + $0x8] sm:$0xff] %vm19_vm1, %v174_v31 }
 0x115   :  { %175 = vst.msk [vmem:[#allocation3] sm:$0xff] %vm19_vm1, %v173_v32 }
 0x116   :  { %300 = shalt.err (!%p297_p4)
}
 0x117   :  { %s301_s17 = scalar_lea.hbm %s435_s3, 256 }
 0x118   :  { %p302_p5 = scmp.ne.s32.totalorder %s435_s3, %s301_s17  ;;  %p305_p6 = scmp.lt.u32.totalorder %s301_s17, %s435_s3 }
 0x11a   :  { %p307_p7 = pnand %p305_p6, %p302_p5 }
 0x11c   :  { %310 = shalt.err (!%p307_p7)
}
 0x11d   :  { %s315_s22 = smov 128   ;;  %s316_s23 = smov 8  }
 0x11e   :  { %188 = dma.vmem_to_hbm [thread:$0]  %s183_s15, 256, %s435_s3, [#allocation4], %s315_s22, %s315_s22, %s316_s23  }
 0x11f   :  { %311 = dma.done.wait [#allocation4], 256  }
 0x120   :  { %312 = vsyncadd [#allocation4], 4294967040 }
 0x121   :  { %192 = vsyncpa [#allocation4], 1 }

</bundles_post_ra>
